<compile_context>
chip_gen: v6e
topology: v6e:2x2x1
jax: 0.10.0
libtpu: 0.0.40
codegen_flags: <defaults>
</compile_context>

<pallas_src>
import jax
import jax.numpy as jnp
from jax.experimental import pallas as pl
from jax.experimental.pallas import tpu as pltpu


def _rdb_conv_kernel(x_ref, w_ref, b_ref, out_ref, xflat_ref, p_ref):
    # x_ref    : (1, C_in, H, W)        one batch element, NCHW, f32
    # w_ref    : (G, 9*C_in)            bf16, tap-major (kh,kw), channel-minor
    # b_ref    : (G, 1)                 f32
    # out_ref  : (1, G, H*Wp)           f32 "extended width" conv output (Wp = W+2)
    # xflat_ref: (C_in, Hp*Wp + 2)      f32 scratch: zero-padded input, spatial flattened
    # p_ref    : (9*C_in, H*Wp)         f32 scratch: im2col patch matrix
    C_in = x_ref.shape[1]
    H = x_ref.shape[2]
    W = x_ref.shape[3]
    Wp = W + 2
    N = out_ref.shape[2]            # H * Wp

    # Build the zero-padded input directly in flattened-spatial form:
    #   xflat[c, i*Wp + j] == x_padded[c, i, j]
    # (Re-zeroed every grid step so megacore-parallel batch splitting stays correct.)
    xflat_ref[...] = jnp.zeros_like(xflat_ref)
    for y in range(H):              # static unroll (H is small; large H would be row-tiled)
        start = (y + 1) * Wp + 1
        xflat_ref[:, start:start + W] = x_ref[0, :, y, :]

    # im2col: tap (kh, kw) of the 3x3 window is a contiguous lane-offset slice of xflat.
    for kh in range(3):
        for kw in range(3):
            t = kh * 3 + kw
            off = kh * Wp + kw
            p_ref[t * C_in:(t + 1) * C_in, :] = xflat_ref[:, off:off + N]

    # Single fused MXU matmul (bf16 operands, f32 accumulate) + bias + ReLU, lane-dense store.
    acc = jnp.dot(w_ref[...],
                  p_ref[...].astype(jnp.bfloat16),
                  preferred_element_type=jnp.float32)          # (G, N) f32
    out_ref[0] = jnp.maximum(acc + b_ref[...], 0.0).astype(out_ref.dtype)


def rdb_conv(x_nchw, weight, bias):
    """x_nchw: (B, C_in, H, W) f32; weight: (G, C_in, 3, 3) (PyTorch OIHW); bias: (G,).
    Returns (B, C_in + G, H, W) == torch.cat((x, relu(conv3x3(x))), dim=1)."""
    B, C_in, H, W = x_nchw.shape
    G = weight.shape[0]
    Hp, Wp = H + 2, W + 2
    N = H * Wp                       # extended spatial extent computed per output row

    # (G, C_in, 3, 3) -> (G, 3, 3, C_in) -> (G, 9*C_in): tap-major / channel-minor order,
    # matching the in-kernel patch stacking. Tiny; negligible one-time cost.
    w_mat = jnp.transpose(weight, (0, 2, 3, 1)).reshape(G, 9 * C_in).astype(jnp.bfloat16)
    b_col = bias.reshape(G, 1).astype(jnp.float32)

    # Explicit VMEM budget: double-buffered in/out blocks + scratches + params, with headroom,
    # clamped so it is valid on v7x's smaller (64 MiB physical) VMEM as well.
    blk_bytes = (C_in * H * W + G * N) * 4
    scratch_bytes = (C_in * (Hp * Wp + 2) + 9 * C_in * N) * 4
    vmem_limit = min(max(4 * blk_bytes + scratch_bytes + (1 << 20), 8 << 20), 32 << 20)

    conv_ext = pl.pallas_call(
        _rdb_conv_kernel,
        out_shape=jax.ShapeDtypeStruct((B, G, N), jnp.float32),
        grid_spec=pltpu.PrefetchScalarGridSpec(
            num_scalar_prefetch=0,
            grid=(B,),
            in_specs=[
                pl.BlockSpec((1, C_in, H, W), lambda b: (b, 0, 0, 0)),
                pl.BlockSpec((G, 9 * C_in), lambda b: (0, 0)),
                pl.BlockSpec((G, 1), lambda b: (0, 0)),
            ],
            out_specs=pl.BlockSpec((1, G, N), lambda b: (b, 0, 0)),
            scratch_shapes=[
                pltpu.VMEM((C_in, Hp * Wp + 2), jnp.float32),   # padded, flattened input
                pltpu.VMEM((9 * C_in, N), jnp.float32),          # im2col patches
            ],
        ),
        compiler_params=pltpu.CompilerParams(
            dimension_semantics=("parallel",),
            vmem_limit_bytes=vmem_limit,
        ),
    )(x_nchw, w_mat, b_col)

    # Drop the 2 garbage columns per row (extended-width trick) and do the channel concat.
    # XLA fuses reshape + slice into the concatenate pass; the reshape itself is a bitcast.
    conv_out = conv_ext.reshape(B, G, H, Wp)[:, :, :, :W]
    return jnp.concatenate([x_nchw, conv_out], axis=1)


def _reference(x_nchw, weight, bias):
    conv = jax.lax.conv_general_dilated(
        x_nchw, weight, window_strides=(1, 1), padding=((1, 1), (1, 1)),
        dimension_numbers=("NCHW", "OIHW", "NCHW"),
    ) + bias.reshape(1, -1, 1, 1)
    return jnp.concatenate([x_nchw, jnp.maximum(conv, 0.0)], axis=1)


if __name__ == "__main__":
    B, C_in, H, W = 2, 4, 16, 16
    G = 8  # growth_rate

    key = jax.random.PRNGKey(0)
    kx, kw, kb = jax.random.split(key, 3)
    x = jax.random.normal(kx, (B, C_in, H, W), dtype=jnp.float32)
    # Deterministic synthetic parameters (shapes from nn.Conv2d(in_c, G, 3, padding=1)).
    fan_in = C_in * 3 * 3
    bound = 1.0 / (fan_in ** 0.5)
    weight = jax.random.uniform(kw, (G, C_in, 3, 3), jnp.float32, -bound, bound)  # OIHW
    bias = jax.random.uniform(kb, (G,), jnp.float32, -bound, bound)

    rdb_conv_jit = jax.jit(rdb_conv)
    out = rdb_conv_jit(x, weight, bias)
    jax.block_until_ready(out)

    ref = _reference(x, weight, bias)
    assert out.shape == (B, C_in + G, H, W)
    max_err = float(jnp.max(jnp.abs(out - ref)))
    # bf16 MXU operands (f32 accumulation) -> small rounding error vs. the f32 reference.
    assert jnp.allclose(out, ref, atol=3e-2, rtol=3e-2), max_err

    print("KERNEL_OK")
</pallas_src>

<mosaic_0001>
module attributes {stable_mosaic.version = 11 : i64} {
  func.func @_rdb_conv_kernel(%arg0: i32, %arg1: memref<1x4x16x16xf32, #tpu.memory_space<vmem>>, %arg2: memref<8x36xbf16, #tpu.memory_space<vmem>>, %arg3: memref<8x1xf32, #tpu.memory_space<vmem>>, %arg4: memref<1x8x288xf32, #tpu.memory_space<vmem>>, %arg5: memref<4x326xf32, #tpu.memory_space<vmem>>, %arg6: memref<36x288xf32, #tpu.memory_space<vmem>>) attributes {dimension_semantics = [#tpu.dimension_semantics<parallel>], iteration_bounds = array<i64: 2>, scalar_prefetch = 0 : i64, scratch_operands = 2 : i64, tpu.core_type = #tpu.core_type<tc>, window_params = [{transform_indices = @transform_0, window_bounds = array<i64: 1, 4, 16, 16>}, {pipeline_mode = #tpu.pipeline_mode<synchronous>, transform_indices = @transform_1, window_bounds = array<i64: 8, 36>}, {pipeline_mode = #tpu.pipeline_mode<synchronous>, transform_indices = @transform_2, window_bounds = array<i64: 8, 1>}, {transform_indices = @transform_3, window_bounds = array<i64: 1, 8, 288>}]} {
    %cst = arith.constant 0.000000e+00 : f32
    %0 = vector.broadcast %cst : f32 to vector<4x326xf32>
    %c0 = arith.constant 0 : index
    %c0_0 = arith.constant 0 : index
    %1 = vector.load %arg5[%c0, %c0_0] : memref<4x326xf32, #tpu.memory_space<vmem>>, vector<4x326xf32>
    tpu.vector_store %arg5[%c0, %c0_0], %0 {strides = array<i32>} : memref<4x326xf32, #tpu.memory_space<vmem>>, vector<4x326xf32>,
    %c0_1 = arith.constant 0 : index
    %c0_2 = arith.constant 0 : index
    %c0_3 = arith.constant 0 : index
    %c0_4 = arith.constant 0 : index
    %2 = vector.load %arg1[%c0_1, %c0_2, %c0_3, %c0_4] : memref<1x4x16x16xf32, #tpu.memory_space<vmem>>, vector<1x4x1x16xf32>
    %3 = vector.shape_cast %2 : vector<1x4x1x16xf32> to vector<4x16xf32>
    %c0_5 = arith.constant 0 : index
    %c19 = arith.constant 19 : index
    %4 = vector.load %arg5[%c0_5, %c19] : memref<4x326xf32, #tpu.memory_space<vmem>>, vector<4x16xf32>
    tpu.vector_store %arg5[%c0_5, %c19], %3 {strides = array<i32>} : memref<4x326xf32, #tpu.memory_space<vmem>>, vector<4x16xf32>,
    %c0_6 = arith.constant 0 : index
    %c0_7 = arith.constant 0 : index
    %c1 = arith.constant 1 : index
    %c0_8 = arith.constant 0 : index
    %5 = vector.load %arg1[%c0_6, %c0_7, %c1, %c0_8] : memref<1x4x16x16xf32, #tpu.memory_space<vmem>>, vector<1x4x1x16xf32>
    %6 = vector.shape_cast %5 : vector<1x4x1x16xf32> to vector<4x16xf32>
    %c0_9 = arith.constant 0 : index
    %c37 = arith.constant 37 : index
    %7 = vector.load %arg5[%c0_9, %c37] : memref<4x326xf32, #tpu.memory_space<vmem>>, vector<4x16xf32>
    tpu.vector_store %arg5[%c0_9, %c37], %6 {strides = array<i32>} : memref<4x326xf32, #tpu.memory_space<vmem>>, vector<4x16xf32>,
    %c0_10 = arith.constant 0 : index
    %c0_11 = arith.constant 0 : index
    %c2 = arith.constant 2 : index
    %c0_12 = arith.constant 0 : index
    %8 = vector.load %arg1[%c0_10, %c0_11, %c2, %c0_12] : memref<1x4x16x16xf32, #tpu.memory_space<vmem>>, vector<1x4x1x16xf32>
    %9 = vector.shape_cast %8 : vector<1x4x1x16xf32> to vector<4x16xf32>
    %c0_13 = arith.constant 0 : index
    %c55 = arith.constant 55 : index
    %10 = vector.load %arg5[%c0_13, %c55] : memref<4x326xf32, #tpu.memory_space<vmem>>, vector<4x16xf32>
    tpu.vector_store %arg5[%c0_13, %c55], %9 {strides = array<i32>} : memref<4x326xf32, #tpu.memory_space<vmem>>, vector<4x16xf32>,
    %c0_14 = arith.constant 0 : index
    %c0_15 = arith.constant 0 : index
    %c3 = arith.constant 3 : index
    %c0_16 = arith.constant 0 : index
    %11 = vector.load %arg1[%c0_14, %c0_15, %c3, %c0_16] : memref<1x4x16x16xf32, #tpu.memory_space<vmem>>, vector<1x4x1x16xf32>
    %12 = vector.shape_cast %11 : vector<1x4x1x16xf32> to vector<4x16xf32>
    %c0_17 = arith.constant 0 : index
    %c73 = arith.constant 73 : index
    %13 = vector.load %arg5[%c0_17, %c73] : memref<4x326xf32, #tpu.memory_space<vmem>>, vector<4x16xf32>
    tpu.vector_store %arg5[%c0_17, %c73], %12 {strides = array<i32>} : memref<4x326xf32, #tpu.memory_space<vmem>>, vector<4x16xf32>,
    %c0_18 = arith.constant 0 : index
    %c0_19 = arith.constant 0 : index
    %c4 = arith.constant 4 : index
    %c0_20 = arith.constant 0 : index
    %14 = vector.load %arg1[%c0_18, %c0_19, %c4, %c0_20] : memref<1x4x16x16xf32, #tpu.memory_space<vmem>>, vector<1x4x1x16xf32>
    %15 = vector.shape_cast %14 : vector<1x4x1x16xf32> to vector<4x16xf32>
    %c0_21 = arith.constant 0 : index
    %c91 = arith.constant 91 : index
    %16 = vector.load %arg5[%c0_21, %c91] : memref<4x326xf32, #tpu.memory_space<vmem>>, vector<4x16xf32>
    tpu.vector_store %arg5[%c0_21, %c91], %15 {strides = array<i32>} : memref<4x326xf32, #tpu.memory_space<vmem>>, vector<4x16xf32>,
    %c0_22 = arith.constant 0 : index
    %c0_23 = arith.constant 0 : index
    %c5 = arith.constant 5 : index
    %c0_24 = arith.constant 0 : index
    %17 = vector.load %arg1[%c0_22, %c0_23, %c5, %c0_24] : memref<1x4x16x16xf32, #tpu.memory_space<vmem>>, vector<1x4x1x16xf32>
    %18 = vector.shape_cast %17 : vector<1x4x1x16xf32> to vector<4x16xf32>
    %c0_25 = arith.constant 0 : index
    %c109 = arith.constant 109 : index
    %19 = vector.load %arg5[%c0_25, %c109] : memref<4x326xf32, #tpu.memory_space<vmem>>, vector<4x16xf32>
    tpu.vector_store %arg5[%c0_25, %c109], %18 {strides = array<i32>} : memref<4x326xf32, #tpu.memory_space<vmem>>, vector<4x16xf32>,
    %c0_26 = arith.constant 0 : index
    %c0_27 = arith.constant 0 : index
    %c6 = arith.constant 6 : index
    %c0_28 = arith.constant 0 : index
    %20 = vector.load %arg1[%c0_26, %c0_27, %c6, %c0_28] : memref<1x4x16x16xf32, #tpu.memory_space<vmem>>, vector<1x4x1x16xf32>
    %21 = vector.shape_cast %20 : vector<1x4x1x16xf32> to vector<4x16xf32>
    %c0_29 = arith.constant 0 : index
    %c127 = arith.constant 127 : index
    %22 = vector.load %arg5[%c0_29, %c127] : memref<4x326xf32, #tpu.memory_space<vmem>>, vector<4x16xf32>
    tpu.vector_store %arg5[%c0_29, %c127], %21 {strides = array<i32>} : memref<4x326xf32, #tpu.memory_space<vmem>>, vector<4x16xf32>,
    %c0_30 = arith.constant 0 : index
    %c0_31 = arith.constant 0 : index
    %c7 = arith.constant 7 : index
    %c0_32 = arith.constant 0 : index
    %23 = vector.load %arg1[%c0_30, %c0_31, %c7, %c0_32] : memref<1x4x16x16xf32, #tpu.memory_space<vmem>>, vector<1x4x1x16xf32>
    %24 = vector.shape_cast %23 : vector<1x4x1x16xf32> to vector<4x16xf32>
    %c0_33 = arith.constant 0 : index
    %c145 = arith.constant 145 : index
    %25 = vector.load %arg5[%c0_33, %c145] : memref<4x326xf32, #tpu.memory_space<vmem>>, vector<4x16xf32>
    tpu.vector_store %arg5[%c0_33, %c145], %24 {strides = array<i32>} : memref<4x326xf32, #tpu.memory_space<vmem>>, vector<4x16xf32>,
    %c0_34 = arith.constant 0 : index
    %c0_35 = arith.constant 0 : index
    %c8 = arith.constant 8 : index
    %c0_36 = arith.constant 0 : index
    %26 = vector.load %arg1[%c0_34, %c0_35, %c8, %c0_36] : memref<1x4x16x16xf32, #tpu.memory_space<vmem>>, vector<1x4x1x16xf32>
    %27 = vector.shape_cast %26 : vector<1x4x1x16xf32> to vector<4x16xf32>
    %c0_37 = arith.constant 0 : index
    %c163 = arith.constant 163 : index
    %28 = vector.load %arg5[%c0_37, %c163] : memref<4x326xf32, #tpu.memory_space<vmem>>, vector<4x16xf32>
    tpu.vector_store %arg5[%c0_37, %c163], %27 {strides = array<i32>} : memref<4x326xf32, #tpu.memory_space<vmem>>, vector<4x16xf32>,
    %c0_38 = arith.constant 0 : index
    %c0_39 = arith.constant 0 : index
    %c9 = arith.constant 9 : index
    %c0_40 = arith.constant 0 : index
    %29 = vector.load %arg1[%c0_38, %c0_39, %c9, %c0_40] : memref<1x4x16x16xf32, #tpu.memory_space<vmem>>, vector<1x4x1x16xf32>
    %30 = vector.shape_cast %29 : vector<1x4x1x16xf32> to vector<4x16xf32>
    %c0_41 = arith.constant 0 : index
    %c181 = arith.constant 181 : index
    %31 = vector.load %arg5[%c0_41, %c181] : memref<4x326xf32, #tpu.memory_space<vmem>>, vector<4x16xf32>
    tpu.vector_store %arg5[%c0_41, %c181], %30 {strides = array<i32>} : memref<4x326xf32, #tpu.memory_space<vmem>>, vector<4x16xf32>,
    %c0_42 = arith.constant 0 : index
    %c0_43 = arith.constant 0 : index
    %c10 = arith.constant 10 : index
    %c0_44 = arith.constant 0 : index
    %32 = vector.load %arg1[%c0_42, %c0_43, %c10, %c0_44] : memref<1x4x16x16xf32, #tpu.memory_space<vmem>>, vector<1x4x1x16xf32>
    %33 = vector.shape_cast %32 : vector<1x4x1x16xf32> to vector<4x16xf32>
    %c0_45 = arith.constant 0 : index
    %c199 = arith.constant 199 : index
    %34 = vector.load %arg5[%c0_45, %c199] : memref<4x326xf32, #tpu.memory_space<vmem>>, vector<4x16xf32>
    tpu.vector_store %arg5[%c0_45, %c199], %33 {strides = array<i32>} : memref<4x326xf32, #tpu.memory_space<vmem>>, vector<4x16xf32>,
    %c0_46 = arith.constant 0 : index
    %c0_47 = arith.constant 0 : index
    %c11 = arith.constant 11 : index
    %c0_48 = arith.constant 0 : index
    %35 = vector.load %arg1[%c0_46, %c0_47, %c11, %c0_48] : memref<1x4x16x16xf32, #tpu.memory_space<vmem>>, vector<1x4x1x16xf32>
    %36 = vector.shape_cast %35 : vector<1x4x1x16xf32> to vector<4x16xf32>
    %c0_49 = arith.constant 0 : index
    %c217 = arith.constant 217 : index
    %37 = vector.load %arg5[%c0_49, %c217] : memref<4x326xf32, #tpu.memory_space<vmem>>, vector<4x16xf32>
    tpu.vector_store %arg5[%c0_49, %c217], %36 {strides = array<i32>} : memref<4x326xf32, #tpu.memory_space<vmem>>, vector<4x16xf32>,
    %c0_50 = arith.constant 0 : index
    %c0_51 = arith.constant 0 : index
    %c12 = arith.constant 12 : index
    %c0_52 = arith.constant 0 : index
    %38 = vector.load %arg1[%c0_50, %c0_51, %c12, %c0_52] : memref<1x4x16x16xf32, #tpu.memory_space<vmem>>, vector<1x4x1x16xf32>
    %39 = vector.shape_cast %38 : vector<1x4x1x16xf32> to vector<4x16xf32>
    %c0_53 = arith.constant 0 : index
    %c235 = arith.constant 235 : index
    %40 = vector.load %arg5[%c0_53, %c235] : memref<4x326xf32, #tpu.memory_space<vmem>>, vector<4x16xf32>
    tpu.vector_store %arg5[%c0_53, %c235], %39 {strides = array<i32>} : memref<4x326xf32, #tpu.memory_space<vmem>>, vector<4x16xf32>,
    %c0_54 = arith.constant 0 : index
    %c0_55 = arith.constant 0 : index
    %c13 = arith.constant 13 : index
    %c0_56 = arith.constant 0 : index
    %41 = vector.load %arg1[%c0_54, %c0_55, %c13, %c0_56] : memref<1x4x16x16xf32, #tpu.memory_space<vmem>>, vector<1x4x1x16xf32>
    %42 = vector.shape_cast %41 : vector<1x4x1x16xf32> to vector<4x16xf32>
    %c0_57 = arith.constant 0 : index
    %c253 = arith.constant 253 : index
    %43 = vector.load %arg5[%c0_57, %c253] : memref<4x326xf32, #tpu.memory_space<vmem>>, vector<4x16xf32>
    tpu.vector_store %arg5[%c0_57, %c253], %42 {strides = array<i32>} : memref<4x326xf32, #tpu.memory_space<vmem>>, vector<4x16xf32>,
    %c0_58 = arith.constant 0 : index
    %c0_59 = arith.constant 0 : index
    %c14 = arith.constant 14 : index
    %c0_60 = arith.constant 0 : index
    %44 = vector.load %arg1[%c0_58, %c0_59, %c14, %c0_60] : memref<1x4x16x16xf32, #tpu.memory_space<vmem>>, vector<1x4x1x16xf32>
    %45 = vector.shape_cast %44 : vector<1x4x1x16xf32> to vector<4x16xf32>
    %c0_61 = arith.constant 0 : index
    %c271 = arith.constant 271 : index
    %46 = vector.load %arg5[%c0_61, %c271] : memref<4x326xf32, #tpu.memory_space<vmem>>, vector<4x16xf32>
    tpu.vector_store %arg5[%c0_61, %c271], %45 {strides = array<i32>} : memref<4x326xf32, #tpu.memory_space<vmem>>, vector<4x16xf32>,
    %c0_62 = arith.constant 0 : index
    %c0_63 = arith.constant 0 : index
    %c15 = arith.constant 15 : index
    %c0_64 = arith.constant 0 : index
    %47 = vector.load %arg1[%c0_62, %c0_63, %c15, %c0_64] : memref<1x4x16x16xf32, #tpu.memory_space<vmem>>, vector<1x4x1x16xf32>
    %48 = vector.shape_cast %47 : vector<1x4x1x16xf32> to vector<4x16xf32>
    %c0_65 = arith.constant 0 : index
    %c289 = arith.constant 289 : index
    %49 = vector.load %arg5[%c0_65, %c289] : memref<4x326xf32, #tpu.memory_space<vmem>>, vector<4x16xf32>
    tpu.vector_store %arg5[%c0_65, %c289], %48 {strides = array<i32>} : memref<4x326xf32, #tpu.memory_space<vmem>>, vector<4x16xf32>,
    %c0_66 = arith.constant 0 : index
    %c0_67 = arith.constant 0 : index
    %50 = vector.load %arg5[%c0_66, %c0_67] : memref<4x326xf32, #tpu.memory_space<vmem>>, vector<4x288xf32>
    %c0_68 = arith.constant 0 : index
    %c0_69 = arith.constant 0 : index
    %51 = vector.load %arg6[%c0_68, %c0_69] : memref<36x288xf32, #tpu.memory_space<vmem>>, vector<4x288xf32>
    tpu.vector_store %arg6[%c0_68, %c0_69], %50 {strides = array<i32>} : memref<36x288xf32, #tpu.memory_space<vmem>>, vector<4x288xf32>,
    %c0_70 = arith.constant 0 : index
    %c1_71 = arith.constant 1 : index
    %52 = vector.load %arg5[%c0_70, %c1_71] : memref<4x326xf32, #tpu.memory_space<vmem>>, vector<4x288xf32>
    %c4_72 = arith.constant 4 : index
    %c0_73 = arith.constant 0 : index
    %53 = vector.load %arg6[%c4_72, %c0_73] : memref<36x288xf32, #tpu.memory_space<vmem>>, vector<4x288xf32>
    tpu.vector_store %arg6[%c4_72, %c0_73], %52 {strides = array<i32>} : memref<36x288xf32, #tpu.memory_space<vmem>>, vector<4x288xf32>,
    %c0_74 = arith.constant 0 : index
    %c2_75 = arith.constant 2 : index
    %54 = vector.load %arg5[%c0_74, %c2_75] : memref<4x326xf32, #tpu.memory_space<vmem>>, vector<4x288xf32>
    %c8_76 = arith.constant 8 : index
    %c0_77 = arith.constant 0 : index
    %55 = vector.load %arg6[%c8_76, %c0_77] : memref<36x288xf32, #tpu.memory_space<vmem>>, vector<4x288xf32>
    tpu.vector_store %arg6[%c8_76, %c0_77], %54 {strides = array<i32>} : memref<36x288xf32, #tpu.memory_space<vmem>>, vector<4x288xf32>,
    %c0_78 = arith.constant 0 : index
    %c18 = arith.constant 18 : index
    %56 = vector.load %arg5[%c0_78, %c18] : memref<4x326xf32, #tpu.memory_space<vmem>>, vector<4x288xf32>
    %c12_79 = arith.constant 12 : index
    %c0_80 = arith.constant 0 : index
    %57 = vector.load %arg6[%c12_79, %c0_80] : memref<36x288xf32, #tpu.memory_space<vmem>>, vector<4x288xf32>
    tpu.vector_store %arg6[%c12_79, %c0_80], %56 {strides = array<i32>} : memref<36x288xf32, #tpu.memory_space<vmem>>, vector<4x288xf32>,
    %c0_81 = arith.constant 0 : index
    %c19_82 = arith.constant 19 : index
    %58 = vector.load %arg5[%c0_81, %c19_82] : memref<4x326xf32, #tpu.memory_space<vmem>>, vector<4x288xf32>
    %c16 = arith.constant 16 : index
    %c0_83 = arith.constant 0 : index
    %59 = vector.load %arg6[%c16, %c0_83] : memref<36x288xf32, #tpu.memory_space<vmem>>, vector<4x288xf32>
    tpu.vector_store %arg6[%c16, %c0_83], %58 {strides = array<i32>} : memref<36x288xf32, #tpu.memory_space<vmem>>, vector<4x288xf32>,
    %c0_84 = arith.constant 0 : index
    %c20 = arith.constant 20 : index
    %60 = vector.load %arg5[%c0_84, %c20] : memref<4x326xf32, #tpu.memory_space<vmem>>, vector<4x288xf32>
    %c20_85 = arith.constant 20 : index
    %c0_86 = arith.constant 0 : index
    %61 = vector.load %arg6[%c20_85, %c0_86] : memref<36x288xf32, #tpu.memory_space<vmem>>, vector<4x288xf32>
    tpu.vector_store %arg6[%c20_85, %c0_86], %60 {strides = array<i32>} : memref<36x288xf32, #tpu.memory_space<vmem>>, vector<4x288xf32>,
    %c0_87 = arith.constant 0 : index
    %c36 = arith.constant 36 : index
    %62 = vector.load %arg5[%c0_87, %c36] : memref<4x326xf32, #tpu.memory_space<vmem>>, vector<4x288xf32>
    %c24 = arith.constant 24 : index
    %c0_88 = arith.constant 0 : index
    %63 = vector.load %arg6[%c24, %c0_88] : memref<36x288xf32, #tpu.memory_space<vmem>>, vector<4x288xf32>
    tpu.vector_store %arg6[%c24, %c0_88], %62 {strides = array<i32>} : memref<36x288xf32, #tpu.memory_space<vmem>>, vector<4x288xf32>,
    %c0_89 = arith.constant 0 : index
    %c37_90 = arith.constant 37 : index
    %64 = vector.load %arg5[%c0_89, %c37_90] : memref<4x326xf32, #tpu.memory_space<vmem>>, vector<4x288xf32>
    %c28 = arith.constant 28 : index
    %c0_91 = arith.constant 0 : index
    %65 = vector.load %arg6[%c28, %c0_91] : memref<36x288xf32, #tpu.memory_space<vmem>>, vector<4x288xf32>
    tpu.vector_store %arg6[%c28, %c0_91], %64 {strides = array<i32>} : memref<36x288xf32, #tpu.memory_space<vmem>>, vector<4x288xf32>,
    %c0_92 = arith.constant 0 : index
    %c38 = arith.constant 38 : index
    %66 = vector.load %arg5[%c0_92, %c38] : memref<4x326xf32, #tpu.memory_space<vmem>>, vector<4x288xf32>
    %c32 = arith.constant 32 : index
    %c0_93 = arith.constant 0 : index
    %67 = vector.load %arg6[%c32, %c0_93] : memref<36x288xf32, #tpu.memory_space<vmem>>, vector<4x288xf32>
    tpu.vector_store %arg6[%c32, %c0_93], %66 {strides = array<i32>} : memref<36x288xf32, #tpu.memory_space<vmem>>, vector<4x288xf32>,
    %c0_94 = arith.constant 0 : index
    %c0_95 = arith.constant 0 : index
    %68 = vector.load %arg2[%c0_94, %c0_95] : memref<8x36xbf16, #tpu.memory_space<vmem>>, vector<8x36xbf16>
    %c0_96 = arith.constant 0 : index
    %c0_97 = arith.constant 0 : index
    %69 = vector.load %arg6[%c0_96, %c0_97] : memref<36x288xf32, #tpu.memory_space<vmem>>, vector<36x288xf32>
    %70 = arith.truncf %69 : vector<36x288xf32> to vector<36x288xbf16>
    %cst_98 = arith.constant dense<0.000000e+00> : vector<8x288xf32>
    %71 = tpu.matmul %68, %70, %cst_98 {dimension_numbers = #tpu.dot_dimension_numbers<[1], [0], [0], [1], [0, 0, 1, 1], [], []>} : vector<8x36xbf16>, vector<36x288xbf16>, vector<8x288xf32> -> vector<8x288xf32>
    %c0_99 = arith.constant 0 : index
    %c0_100 = arith.constant 0 : index
    %72 = vector.load %arg3[%c0_99, %c0_100] : memref<8x1xf32, #tpu.memory_space<vmem>>, vector<8x1xf32>
    %73 = vector.broadcast %72 : vector<8x1xf32> to vector<8x288xf32>
    %74 = arith.addf %71, %73 : vector<8x288xf32>
    %cst_101 = arith.constant 0.000000e+00 : f32
    %75 = vector.broadcast %cst_101 : f32 to vector<8x288xf32>
    %76 = arith.maximumf %74, %75 : vector<8x288xf32>
    %c0_102 = arith.constant 0 : index
    %c0_103 = arith.constant 0 : index
    %c0_104 = arith.constant 0 : index
    %77 = vector.load %arg4[%c0_102, %c0_103, %c0_104] : memref<1x8x288xf32, #tpu.memory_space<vmem>>, vector<1x8x288xf32>
    %78 = vector.shape_cast %77 : vector<1x8x288xf32> to vector<8x288xf32>
    %79 = vector.shape_cast %76 : vector<8x288xf32> to vector<1x8x288xf32>
    tpu.vector_store %arg4[%c0_102, %c0_103, %c0_104], %79 {strides = array<i32>} : memref<1x8x288xf32, #tpu.memory_space<vmem>>, vector<1x8x288xf32>,
    return
  }
  func.func @transform_0(%arg0: i32) -> (i32, i32, i32, i32) {
    %c0_i32 = arith.constant 0 : i32
    %c0_i32_0 = arith.constant 0 : i32
    %c0_i32_1 = arith.constant 0 : i32
    %c0_i32_2 = arith.constant 0 : i32
    return %arg0, %c0_i32, %c0_i32_0, %c0_i32_1 : i32, i32, i32, i32
  }
  func.func @transform_1(%arg0: i32) -> (i32, i32) {
    %c0_i32 = arith.constant 0 : i32
    %c0_i32_0 = arith.constant 0 : i32
    %c0_i32_1 = arith.constant 0 : i32
    return %c0_i32, %c0_i32_0 : i32, i32
  }
  func.func @transform_2(%arg0: i32) -> (i32, i32) {
    %c0_i32 = arith.constant 0 : i32
    %c0_i32_0 = arith.constant 0 : i32
    %c0_i32_1 = arith.constant 0 : i32
    return %c0_i32, %c0_i32_0 : i32, i32
  }
  func.func @transform_3(%arg0: i32) -> (i32, i32, i32) {
    %c0_i32 = arith.constant 0 : i32
    %c0_i32_0 = arith.constant 0 : i32
    %c0_i32_1 = arith.constant 0 : i32
    return %arg0, %c0_i32, %c0_i32_0 : i32, i32, i32
  }
}

</mosaic_0001>

<bundles_post_ra>
// kernel: rdb_conv.1
= control target key start
LH: loop header
LB: loop body
LE: loop exit
PB: predicated region body
PF: predicated region fallthrough
CT: control target
= control target key end

     0   :  { %s1022_s12 = smov 0   ;;  %s1256_s0 = inlined_call_operand.vmem [shape: f32[2,4,16,16], index: 0, kind: input, shape index: {}]   ;;  %s1257_s1 = inlined_call_operand.vmem [shape: bf16[8,36], index: 1, kind: input, shape index: {}]   ;;  %s1258_s2 = inlined_call_operand.vmem [shape: f32[8,1], index: 2, kind: input, shape index: {}]   ;;  %s1259_s3 = inlined_call_operand.vmem [shape: f32[2,8,288], index: 3, kind: output, shape index: {}]  }
   0x1 LB: > { %s904_s13 = sadd.s32 4294967295, %s976_s12   ;;  %p908_p0 = scmp.ge.s32.totalorder %s976_s12, 1  ;;  %s976_s12 = sphi %s1022_s12, %s13_s12  }
   0x2   : > { %p137_p1 = scmp.lt.s32.totalorder %s976_s12, 3 }
   0x4   : > { %p138_p2 = pnand %p908_p0, %p137_p1 }
   0x5   : > { %p161_p3 = scmp.lt.s32.totalorder (!%p138_p2), %s904_s13, 1  ;;  %s979_s18 = smov (!%p138_p2), 55  }
   0x6   : > { %141 = sbr.rel (%p138_p2) target bundleno = 549 (0x225), region = 32  ;;  %s980_s19 = smov (!%p138_p2), 19  }
   0x7   : > { %s981_s20 = smov (!%p138_p2), 73   ;;  %s982_s21 = smov (!%p138_p2), 37  }
   0x8   : > { %s983_s22 = smov (!%p138_p2), 91   ;;  %s984_s23 = smov (!%p138_p2), 127  }
   0x9   : > { %s985_s24 = smov (!%p138_p2), 17   ;;  %s986_s25 = smov (!%p138_p2), 109  }
   0xa   : > { %s987_s26 = smov (!%p138_p2), 53   ;;  %s988_s27 = smov (!%p138_p2), 35  }
   0xb   : > { %s1261_s13 = smov (!%p161_p3, %s904_s13), 1  ;;  %v978_v0 = vmov 0.0   ;;  %vm184_vm0 = vcmask 1041409   ;;  %vm186_vm1 = vcmask 1045509   ;;  %vm189_vm2 = vcmask 1042434   ;;  %s989_s28 = smov 125  }
   0xc   : > { %172 = vst [vmem:[#allocation2] sm:$0xff] %v978_v0  ;;  %922 = vmatprep.subr.bf16.mxu1 %v978_v0  ;;  %s917_s14 = sshll.u32 %s1261_s13, 6  ;;  %vm191_vm3 = vcmask 1046534   ;;  %vm194_vm4 = vcmask 1043459   ;;  %vm196_vm5 = vcmask 1047559   ;;  %s990_s29 = smov 71  }
   0xd   : > { %s1038_s17 = scalar_lea.vmem %s1256_s0, %s917_s14  ;;  %s991_s30 = smov 89   ;;  %vm173_vm6 = vcmask 568320   ;;  %vm201_vm7 = vcmask 281752   ;;  %vm223_vm8 = vcmask 429352   ;;  %vm245_vm9 = vcmask 576952  }
   0xe   : > { %v225_v1 = vld [vmem:[%s1038_s17 + $0x2] sm:$0x1]  ;;  %v226_v2 = vld [vmem:[%s1038_s17 + $0x12] sm:$0x1]  ;;  %v175_v7 = vld [vmem:[%s1038_s17] sm:$0x1] }
   0xf   : > { %v227_v3 = vld [vmem:[%s1038_s17 + $0x22] sm:$0x1]  ;;  %v228_v4 = vld [vmem:[%s1038_s17 + $0x32] sm:$0x1]  ;;  %v233_v5 = vrot.slane %v226_v2, 7  ;;  %s992_s4 = smov 107  }
  0x10   : > { %v236_v6 = vrot.slane %v227_v3, 6  ;;  %v239_v8 = vrot.slane %v228_v4, 5  ;;  %v176_v9 = vld [vmem:[%s1038_s17 + $0x10] sm:$0x1]  ;;  %v177_v10 = vld [vmem:[%s1038_s17 + $0x20] sm:$0x1] }
  0x11   : > { %v234_v11 = vsel %vm184_vm0, %v233_v5, %v225_v1  ;;  %v178_v12 = vld [vmem:[%s1038_s17 + $0x30] sm:$0x1]  ;;  %v183_v13 = vrot.slane %v176_v9, 7  ;;  %v188_v14 = vrot.slane %v177_v10, 6  ;;  %v247_v15 = vld [vmem:[%s1038_s17 + $0x3] sm:$0x1] }
  0x12   : > { %v235_v16 = vsel %vm186_vm1, %v233_v5, %v234_v11  ;;  %v193_v17 = vrot.slane %v178_v12, 5  ;;  %v248_v18 = vld [vmem:[%s1038_s17 + $0x13] sm:$0x1]  ;;  %v249_v19 = vld [vmem:[%s1038_s17 + $0x23] sm:$0x1]  ;;  %s993_s5 = smov 15  }
  0x13   : > { %v237_v20 = vsel %vm189_vm2, %v236_v6, %v235_v16  ;;  %v185_v21 = vsel %vm184_vm0, %v183_v13, %v175_v7  ;;  %v250_v22 = vld [vmem:[%s1038_s17 + $0x33] sm:$0x1]  ;;  %v255_v23 = vrot.slane %v248_v18, 7  ;;  %v258_v24 = vrot.slane %v249_v19, 6  ;;  %v203_v25 = vld [vmem:[%s1038_s17 + $0x1] sm:$0x1] }
  0x14   : > { %v238_v26 = vsel %vm191_vm3, %v236_v6, %v237_v20  ;;  %v187_v27 = vsel %vm186_vm1, %v183_v13, %v185_v21  ;;  %v261_v28 = vrot.slane %v250_v22, 5  ;;  %v204_v29 = vld [vmem:[%s1038_s17 + $0x11] sm:$0x1]  ;;  %v205_v30 = vld [vmem:[%s1038_s17 + $0x21] sm:$0x1]  ;;  %s994_s6 = smov 33  }
  0x15   : > { %v240_v31 = vsel %vm194_vm4, %v239_v8, %v238_v26  ;;  %v190_v32 = vsel %vm189_vm2, %v188_v14, %v187_v27  ;;  %v256_v33 = vsel %vm184_vm0, %v255_v23, %v247_v15  ;;  %v206_v34 = vld [vmem:[%s1038_s17 + $0x31] sm:$0x1]  ;;  %v211_v35 = vrot.slane %v204_v29, 7  ;;  %v270_v40 = vld [vmem:[%s1038_s17 + $0x14] sm:$0x1]  ;;  %s995_s7 = smov 90  }
  0x16   : > { %v241_v36 = vsel %vm196_vm5, %v239_v8, %v240_v31  ;;  %v192_v37 = vsel %vm191_vm3, %v188_v14, %v190_v32  ;;  %v257_v38 = vsel %vm186_vm1, %v255_v23, %v256_v33  ;;  %v214_v39 = vrot.slane %v205_v30, 6  ;;  %v271_v41 = vld [vmem:[%s1038_s17 + $0x24] sm:$0x1]  ;;  %v272_v47 = vld [vmem:[%s1038_s17 + $0x34] sm:$0x1]  ;;  %s996_s8 = smov 108  }
  0x17   : > { %242 = vrot.lane.b32.xlu1 %v241_v36, %s979_s18  ;;  %v195_v42 = vsel %vm194_vm4, %v193_v17, %v192_v37  ;;  %v259_v43 = vsel %vm189_vm2, %v258_v24, %v257_v38  ;;  %v212_v44 = vsel %vm184_vm0, %v211_v35, %v203_v25  ;;  %v217_v45 = vrot.slane %v206_v34, 5  ;;  %v269_v46 = vld [vmem:[%s1038_s17 + $0x4] sm:$0x1]  ;;  %v314_v52 = vld [vmem:[%s1038_s17 + $0x16] sm:$0x1]  ;;  %s997_s9 = smov 92  }
  0x18   : > { %v197_v48 = vsel %vm196_vm5, %v193_v17, %v195_v42  ;;  %v260_v49 = vsel %vm191_vm3, %v258_v24, %v259_v43  ;;  %v213_v50 = vsel %vm186_vm1, %v211_v35, %v212_v44  ;;  %v277_v51 = vrot.slane %v270_v40, 7  ;;  %v315_v53 = vld [vmem:[%s1038_s17 + $0x26] sm:$0x1]  ;;  %v316_v59 = vld [vmem:[%s1038_s17 + $0x36] sm:$0x1]  ;;  %s998_s10 = smov 110  }
  0x19   : > { %198 = vrot.lane.b32.xlu0 %v197_v48, %s980_s19  ;;  %v262_v54 = vsel %vm194_vm4, %v261_v28, %v260_v49  ;;  %v215_v55 = vsel %vm189_vm2, %v214_v39, %v213_v50  ;;  %v280_v56 = vrot.slane %v271_v41, 6  ;;  %v283_v57 = vrot.slane %v272_v47, 5  ;;  %v313_v58 = vld [vmem:[%s1038_s17 + $0x6] sm:$0x1]  ;;  %v341_v1 = vld [vmem:[%s1038_s17 + $0x17] sm:$0x1] }
  0x1a   : > { %v263_v60 = vsel %vm196_vm5, %v261_v28, %v262_v54  ;;  %v216_v61 = vsel %vm191_vm3, %v214_v39, %v215_v55  ;;  %v278_v62 = vsel %vm184_vm0, %v277_v51, %v269_v46  ;;  %v321_v63 = vrot.slane %v314_v52, 7  ;;  %v342_v2 = vld [vmem:[%s1038_s17 + $0x27] sm:$0x1]  ;;  %v343_v8 = vld [vmem:[%s1038_s17 + $0x37] sm:$0x1]  ;;  %s999_s11 = smov 126  }
  0x1b   : > { %264 = vrot.lane.b32.xlu1 %v263_v60, %s981_s20  ;;  %v218_v3 = vsel %vm194_vm4, %v217_v45, %v216_v61  ;;  %v279_v4 = vsel %vm186_vm1, %v277_v51, %v278_v62  ;;  %v324_v5 = vrot.slane %v315_v53, 6  ;;  %v327_v6 = vrot.slane %v316_v59, 5  ;;  %v340_v7 = vld [vmem:[%s1038_s17 + $0x7] sm:$0x1]  ;;  %v292_v13 = vld [vmem:[%s1038_s17 + $0x15] sm:$0x1] }
  0x1c   : > { %v219_v9 = vsel %vm196_vm5, %v217_v45, %v218_v3  ;;  %v281_v10 = vsel %vm189_vm2, %v280_v56, %v279_v4  ;;  %v322_v11 = vsel %vm184_vm0, %v321_v63, %v313_v58  ;;  %v348_v12 = vrot.slane %v341_v1, 7  ;;  %v293_v14 = vld [vmem:[%s1038_s17 + $0x25] sm:$0x1]  ;;  %v294_v20 = vld [vmem:[%s1038_s17 + $0x35] sm:$0x1]  ;;  %s932_s18 = smul.u32 24, %s1261_s13 }
  0x1d   : > { %220 = vrot.lane.b32.xlu0 %v219_v9, %s982_s21  ;;  %v282_v15 = vsel %vm191_vm3, %v280_v56, %v281_v10  ;;  %v323_v16 = vsel %vm186_vm1, %v321_v63, %v322_v11  ;;  %v351_v17 = vrot.slane %v342_v2, 6  ;;  %v354_v18 = vrot.slane %v343_v8, 5  ;;  %v291_v19 = vld [vmem:[%s1038_s17 + $0x5] sm:$0x1]  ;;  %v385_v25 = vld [vmem:[%s1038_s17 + $0x19] sm:$0x1] }
  0x1e   : > { %v284_v21 = vsel %vm194_vm4, %v283_v57, %v282_v15  ;;  %v325_v22 = vsel %vm189_vm2, %v324_v5, %v323_v16  ;;  %v349_v23 = vsel %vm184_vm0, %v348_v12, %v340_v7  ;;  %v299_v24 = vrot.slane %v292_v13, 7  ;;  %v386_v30 = vld [vmem:[%s1038_s17 + $0x29] sm:$0x1]  ;;  %v387_v31 = vld [vmem:[%s1038_s17 + $0x39] sm:$0x1]  ;;  %s170_s21 = scalar_lea.vmem %s1259_s3, %s932_s18 }
  0x1f   : > { %v285_v26 = vsel %vm196_vm5, %v283_v57, %v284_v21  ;;  %v326_v27 = vsel %vm191_vm3, %v324_v5, %v325_v22  ;;  %v350_v28 = vsel %vm186_vm1, %v348_v12, %v349_v23  ;;  %v302_v29 = vrot.slane %v293_v14, 6  ;;  %v384_v36 = vld [vmem:[%s1038_s17 + $0x9] sm:$0x1]  ;;  %v363_v37 = vld [vmem:[%s1038_s17 + $0x18] sm:$0x1] }
  0x20   : > { %286 = vrot.lane.b32.xlu1 %v285_v26, %s983_s22  ;;  %v328_v32 = vsel %vm194_vm4, %v327_v6, %v326_v27  ;;  %v352_v33 = vsel %vm189_vm2, %v351_v17, %v350_v28  ;;  %v300_v34 = vsel %vm184_vm0, %v299_v24, %v291_v19  ;;  %v305_v35 = vrot.slane %v294_v20, 5  ;;  %v364_v42 = vld [vmem:[%s1038_s17 + $0x28] sm:$0x1]  ;;  %v365_v43 = vld [vmem:[%s1038_s17 + $0x38] sm:$0x1] }
  0x21   : > { %v329_v38 = vsel %vm196_vm5, %v327_v6, %v328_v32  ;;  %v353_v39 = vsel %vm191_vm3, %v351_v17, %v352_v33  ;;  %v301_v40 = vsel %vm186_vm1, %v299_v24, %v300_v34  ;;  %v392_v41 = vrot.slane %v385_v25, 7  ;;  %v362_v48 = vld [vmem:[%s1038_s17 + $0x8] sm:$0x1]  ;;  %v473_v49 = vld [vmem:[%s1038_s17 + $0x1d] sm:$0x1] }
  0x22   : > { %330 = vrot.lane.b32.xlu0 %v329_v38, %s984_s23  ;;  %v355_v44 = vsel %vm194_vm4, %v354_v18, %v353_v39  ;;  %v303_v45 = vsel %vm189_vm2, %v302_v29, %v301_v40  ;;  %v395_v46 = vrot.slane %v386_v30, 6  ;;  %v398_v47 = vrot.slane %v387_v31, 5  ;;  %v474_v54 = vld [vmem:[%s1038_s17 + $0x2d] sm:$0x1]  ;;  %v475_v55 = vld [vmem:[%s1038_s17 + $0x3d] sm:$0x1] }
  0x23   : > { %v356_v50 = vsel %vm196_vm5, %v354_v18, %v355_v44  ;;  %v304_v51 = vsel %vm191_vm3, %v302_v29, %v303_v45  ;;  %v393_v52 = vsel %vm184_vm0, %v392_v41, %v384_v36  ;;  %v370_v53 = vrot.slane %v363_v37, 7  ;;  %v472_v60 = vld [vmem:[%s1038_s17 + $0xd] sm:$0x1]  ;;  %v407_v61 = vld [vmem:[%s1038_s17 + $0x1a] sm:$0x1] }
  0x24   : > { %357 = vrot.lane.b32.xlu1 %v356_v50, %s985_s24  ;;  %v306_v56 = vsel %vm194_vm4, %v305_v35, %v304_v51  ;;  %v394_v57 = vsel %vm186_vm1, %v392_v41, %v393_v52  ;;  %v373_v58 = vrot.slane %v364_v42, 6  ;;  %v376_v59 = vrot.slane %v365_v43, 5  ;;  %v408_v3 = vld [vmem:[%s1038_s17 + $0x2a] sm:$0x1]  ;;  %v409_v9 = vld [vmem:[%s1038_s17 + $0x3a] sm:$0x1] }
  0x25   : > { %v307_v62 = vsel %vm196_vm5, %v305_v35, %v306_v56  ;;  %v396_v63 = vsel %vm189_vm2, %v395_v46, %v394_v57  ;;  %v371_v1 = vsel %vm184_vm0, %v370_v53, %v362_v48  ;;  %v480_v2 = vrot.slane %v473_v49, 7  ;;  %v406_v8 = vld [vmem:[%s1038_s17 + $0xa] sm:$0x1]  ;;  %v429_v14 = vld [vmem:[%s1038_s17 + $0x1b] sm:$0x1] }
  0x26   : > { %308 = vrot.lane.b32.xlu0 %v307_v62, %s986_s25  ;;  %v397_v4 = vsel %vm191_vm3, %v395_v46, %v396_v63  ;;  %v372_v5 = vsel %vm186_vm1, %v370_v53, %v371_v1  ;;  %v483_v6 = vrot.slane %v474_v54, 6  ;;  %v486_v7 = vrot.slane %v475_v55, 5  ;;  %v430_v19 = vld [vmem:[%s1038_s17 + $0x2b] sm:$0x1]  ;;  %v431_v20 = vld [vmem:[%s1038_s17 + $0x3b] sm:$0x1] }
  0x27   : > { %v399_v10 = vsel %vm194_vm4, %v398_v47, %v397_v4  ;;  %v374_v11 = vsel %vm189_vm2, %v373_v58, %v372_v5  ;;  %v481_v12 = vsel %vm184_vm0, %v480_v2, %v472_v60  ;;  %v414_v13 = vrot.slane %v407_v61, 7  ;;  %v428_v25 = vld [vmem:[%s1038_s17 + $0xb] sm:$0x1]  ;;  %v451_v26 = vld [vmem:[%s1038_s17 + $0x1c] sm:$0x1] }
  0x28   : > { %v400_v15 = vsel %vm196_vm5, %v398_v47, %v399_v10  ;;  %v375_v16 = vsel %vm191_vm3, %v373_v58, %v374_v11  ;;  %v482_v17 = vsel %vm186_vm1, %v480_v2, %v481_v12  ;;  %v417_v18 = vrot.slane %v408_v3, 6  ;;  %v452_v31 = vld [vmem:[%s1038_s17 + $0x2c] sm:$0x1]  ;;  %v453_v32 = vld [vmem:[%s1038_s17 + $0x3c] sm:$0x1] }
  0x29   : > { %401 = vrot.lane.b32.xlu1 %v400_v15, %s987_s26  ;;  %v377_v21 = vsel %vm194_vm4, %v376_v59, %v375_v16  ;;  %v484_v22 = vsel %vm189_vm2, %v483_v6, %v482_v17  ;;  %v415_v23 = vsel %vm184_vm0, %v414_v13, %v406_v8  ;;  %v420_v24 = vrot.slane %v409_v9, 5  ;;  %v450_v37 = vld [vmem:[%s1038_s17 + $0xc] sm:$0x1]  ;;  %v500_v38 = vld [vmem:[%s1038_s17 + $0x1e] sm:$0x1] }
  0x2a   : > { %v378_v27 = vsel %vm196_vm5, %v376_v59, %v377_v21  ;;  %v485_v28 = vsel %vm191_vm3, %v483_v6, %v484_v22  ;;  %v416_v29 = vsel %vm186_vm1, %v414_v13, %v415_v23  ;;  %v436_v30 = vrot.slane %v429_v14, 7  ;;  %v501_v43 = vld [vmem:[%s1038_s17 + $0x2e] sm:$0x1]  ;;  %v502_v44 = vld [vmem:[%s1038_s17 + $0x3e] sm:$0x1] }
  0x2b   : > { %379 = vrot.lane.b32.xlu0 %v378_v27, %s988_s27  ;;  %v487_v33 = vsel %vm194_vm4, %v486_v7, %v485_v28  ;;  %v418_v34 = vsel %vm189_vm2, %v417_v18, %v416_v29  ;;  %v439_v35 = vrot.slane %v430_v19, 6  ;;  %v442_v36 = vrot.slane %v431_v20, 5  ;;  %v499_v49 = vld [vmem:[%s1038_s17 + $0xe] sm:$0x1]  ;;  %v522_v50 = vld [vmem:[%s1038_s17 + $0x1f] sm:$0x1] }
  0x2c   : > { %v488_v39 = vsel %vm196_vm5, %v486_v7, %v487_v33  ;;  %v419_v40 = vsel %vm191_vm3, %v417_v18, %v418_v34  ;;  %v437_v41 = vsel %vm184_vm0, %v436_v30, %v428_v25  ;;  %v458_v42 = vrot.slane %v451_v26, 7  ;;  %v523_v55 = vld [vmem:[%s1038_s17 + $0x2f] sm:$0x1]  ;;  %v524_v61 = vld [vmem:[%s1038_s17 + $0x3f] sm:$0x1] }
  0x2d   : > { %489 = vrot.lane.b32.xlu1 %v488_v39, %s989_s28  ;;  %v421_v45 = vsel %vm194_vm4, %v420_v24, %v419_v40  ;;  %v438_v46 = vsel %vm186_vm1, %v436_v30, %v437_v41  ;;  %v461_v47 = vrot.slane %v452_v31, 6  ;;  %v464_v48 = vrot.slane %v453_v32, 5  ;;  %v521_v60 = vld [vmem:[%s1038_s17 + $0xf] sm:$0x1]  ;;  %174 = vst.msk [vmem:[#allocation2 + $0x8] sm:$0xf] %vm173_vm6, %v978_v0 }
  0x2e   : > { %v422_v51 = vsel %vm196_vm5, %v420_v24, %v421_v45  ;;  %v440_v52 = vsel %vm189_vm2, %v439_v35, %v438_v46  ;;  %v459_v53 = vsel %vm184_vm0, %v458_v42, %v450_v37  ;;  %v507_v54 = vrot.slane %v500_v38, 7 }
  0x2f   : > { %423 = vrot.lane.b32.xlu0 %v422_v51, %s990_s29  ;;  %v441_v56 = vsel %vm191_vm3, %v439_v35, %v440_v52  ;;  %v460_v57 = vsel %vm186_vm1, %v458_v42, %v459_v53  ;;  %v510_v58 = vrot.slane %v501_v43, 6  ;;  %v513_v59 = vrot.slane %v502_v44, 5  ;;  %v741_v53 = vld [vmem:[%s1258_s2] sm:$0xff] }
  0x30   : > { %v443_v62 = vsel %vm194_vm4, %v442_v36, %v441_v56  ;;  %v462_v63 = vsel %vm189_vm2, %v461_v47, %v460_v57  ;;  %v508_v1 = vsel %vm184_vm0, %v507_v54, %v499_v49  ;;  %v529_v2 = vrot.slane %v522_v50, 7 }
  0x31   : > { %v444_v3 = vsel %vm196_vm5, %v442_v36, %v443_v62  ;;  %v463_v4 = vsel %vm191_vm3, %v461_v47, %v462_v63  ;;  %v509_v5 = vsel %vm186_vm1, %v507_v54, %v508_v1  ;;  %v532_v6 = vrot.slane %v523_v55, 6 }
  0x32   : > { %v465_v7 = vsel %vm194_vm4, %v464_v48, %v463_v4  ;;  %v511_v8 = vsel %vm189_vm2, %v510_v58, %v509_v5  ;;  %v530_v9 = vsel %vm184_vm0, %v529_v2, %v521_v60  ;;  %v535_v10 = vrot.slane %v524_v61, 5 }
  0x33   : > { %445 = vrot.lane.b32.xlu0 %v444_v3, %s991_s30  ;;  %v466_v11 = vsel %vm196_vm5, %v464_v48, %v465_v7  ;;  %v512_v12 = vsel %vm191_vm3, %v510_v58, %v511_v8  ;;  %v531_v13 = vsel %vm186_vm1, %v529_v2, %v530_v9  ;;  %vm267_vm10 = vcmask 724552  }
  0x34   : > { %467 = vrot.lane.b32.xlu1 %v466_v11, %s992_s4  ;;  %v514_v14 = vsel %vm194_vm4, %v513_v59, %v512_v12  ;;  %v533_v15 = vsel %vm189_vm2, %v532_v6, %v531_v13  ;;  %vm289_vm11 = vcmask 872152   ;;  %vm336_vm12 = vcmask 1044472  }
  0x35   : > { %v515_v16 = vsel %vm196_vm5, %v513_v59, %v514_v14  ;;  %v534_v17 = vsel %vm191_vm3, %v532_v6, %v533_v15  ;;  %vm337_vm13 = vcmask 121860   ;;  %vm333_vm14 = vcmask 1039360  }
  0x36   : > { %v536_v18 = vsel %vm194_vm4, %v535_v10, %v534_v17  ;;  %vm311_vm15 = vcmask 1019752   ;;  %vm338_vm0 = vmor %vm337_vm13, %vm336_vm12  ;;  %vm360_vm1 = vcmask 265352   ;;  %vm382_vm2 = vcmask 412952  }
  0x37   : > { %516 = vrot.lane.b32.xlu0 %v515_v16, %s993_s5  ;;  %v537_v19 = vsel %vm196_vm5, %v535_v10, %v536_v18  ;;  %vm404_vm3 = vcmask 560552   ;;  %vm426_vm4 = vcmask 708152   ;;  %vm495_vm5 = vcmask 1044456  }
  0x38   : > { %538 = vrot.lane.b32.xlu1 %v537_v19, %s994_s6  ;;  %vm496_vm6 = vcmask 105476   ;;  %vm541_vm12 = vcmask 396552   ;;  %vm550_vm13 = vcmask 257024   ;;  %v1001_v52 = vmov 0  }
  0x39   : > { %793 = vmatprep.mubr.bf16.mxu0 %v1001_v52  ;;  %965 = vset.pattern.permute.xlu0 %v1001_v52 }
  0x89   : > { %v243_v20 = vpop.permute.xlu1 %242 }
  0x8b   : > { %v199_v21 = vpop.permute.xlu0 %198 }
  0x8c   : > { %202 = vst.msk [vmem:[#allocation2] sm:$0xf] %vm201_vm7, %v199_v21  ;;  %vm448_vm7 = vcmask 855752  }
  0x8d   : > { %v265_v22 = vpop.permute.xlu1 %264 }
  0x8f   : > { %v221_v23 = vpop.permute.xlu0 %220 }
  0x90   : > { %224 = vst.msk [vmem:[#allocation2] sm:$0xf] %vm223_vm8, %v221_v23  ;;  %vm492_vm8 = vcmask 1022976  }
  0x91   : > { %246 = vst.msk [vmem:[#allocation2] sm:$0xf] %vm245_vm9, %v243_v20  ;;  %vm470_vm9 = vcmask 1003352  }
  0x92   : > { %v287_v24 = vpop.permute.xlu1 %286  ;;  %268 = vst.msk [vmem:[#allocation2] sm:$0xf] %vm267_vm10, %v265_v22  ;;  %vm497_vm10 = vmor %vm496_vm6, %vm495_vm5  ;;  %vm571_vm5 = vcmask 261124   ;;  %vm666_vm6 = vcmask 752640  }
  0x93   : > { %290 = vst.msk [vmem:[#allocation2] sm:$0xf] %vm289_vm11, %v287_v24  ;;  %vm519_vm11 = vcmask 248952  }
  0x94   : > { %v331_v25 = vpop.permute.xlu0 %330 }
  0x95   : > { %v332_v26 = vrot.slane %v331_v25, 4 }
  0x96   : > { %v358_v27 = vpop.permute.xlu1 %357 }
  0x97   : > { %v334_v29 = vsel %vm333_vm14, %v332_v26, %v331_v25 }
  0x98   : > { %v309_v28 = vpop.permute.xlu0 %308 }
  0x99   : > { %312 = vst.msk [vmem:[#allocation2] sm:$0xf] %vm311_vm15, %v309_v28  ;;  %vm1000_vm15 = vmmov 0  }
  0x9a   : > { %339 = vst.msk [vmem:[#allocation2] sm:$0xff] %vm338_vm0, %v334_v29  ;;  %928 = vmatprep.mubr.msk.bf16.mxu1 %vm1000_vm15, %v978_v0  ;;  %vm751_vm0 = vcmask 1041408  }
  0x9b   : > { %v402_v30 = vpop.permute.xlu1 %401  ;;  %361 = vst.msk [vmem:[#allocation2 + $0x4] sm:$0xf] %vm360_vm1, %v358_v27  ;;  %vm646_vm1 = vcmask 883712  }
  0x9d   : > { %v380_v31 = vpop.permute.xlu0 %379 }
  0x9e   : > { %383 = vst.msk [vmem:[#allocation2 + $0x4] sm:$0xf] %vm382_vm2, %v380_v31  ;;  %vm687_vm2 = vcmask 744448  }
  0x9f   : > { %405 = vst.msk [vmem:[#allocation2 + $0x4] sm:$0xf] %vm404_vm3, %v402_v30  ;;  %v490_v32 = vpop.permute.xlu1 %489  ;;  %vm707_vm3 = vcmask 736256  }
  0xa0   : > { %v491_v34 = vrot.slane %v490_v32, 4 }
  0xa1   : > { %v424_v33 = vpop.permute.xlu0 %423 }
  0xa2   : > { %427 = vst.msk [vmem:[#allocation2 + $0x4] sm:$0xf] %vm426_vm4, %v424_v33  ;;  %v493_v37 = vsel %vm492_vm8, %v491_v34, %v490_v32  ;;  %vm625_vm4 = vcmask 891904   ;;  %vm605_vm8 = vcmask 900096  }
  0xa5   : > { %v446_v35 = vpop.permute.xlu0 %445 }
  0xa6   : > { %449 = vst.msk [vmem:[#allocation2 + $0x4] sm:$0xf] %vm448_vm7, %v446_v35  ;;  %v468_v36 = vpop.permute.xlu1 %467  ;;  %vm584_vm7 = vcmask 1031168  }
  0xa7   : > { %471 = vst.msk [vmem:[#allocation2 + $0x4] sm:$0xf] %vm470_vm9, %v468_v36  ;;  %vm847_vm9 = vcmask 261120  }
  0xa8   : > { %498 = vst.msk [vmem:[#allocation2 + $0x4] sm:$0xff] %vm497_vm10, %v493_v37 }
  0xa9   : > { %v517_v38 = vpop.permute.xlu0 %516 }
  0xaa   : > { %520 = vst.msk [vmem:[#allocation2 + $0x8] sm:$0xf] %vm519_vm11, %v517_v38  ;;  %v539_v39 = vpop.permute.xlu1 %538 }
  0xab   : > { %542 = vst.msk [vmem:[#allocation2 + $0x8] sm:$0xf] %vm541_vm12, %v539_v39 }
  0xaf   : > { %v543_v40 = vld [vmem:[#allocation2] sm:$0xff] }
  0xb0   : > { %548 = vst [vmem:[#allocation3] sm:$0xf] %v543_v40  ;;  %701 = vrot.lane.b32.xlu0 %v543_v40, %s995_s7  ;;  %v700_v41 = vcombine.high %v543_v40, %v543_v40  ;;  %642 = vrot.lane.b32.xlu1 %v543_v40, %s996_s8  ;;  %v638_v46 = vcombine.low %v543_v40, %v543_v40 }
  0xb2   : > { %v697_v42 = vld [vmem:[#allocation2 + $0x8] sm:$0xf]  ;;  %549 = vst [vmem:[#allocation3 + $0x8] sm:$0xf] %v700_v41 }
  0xb3   : > { %v544_v43 = vld [vmem:[#allocation2 + $0x8] sm:$0xf] }
  0xb4   : > { %683 = vrot.lane.b32.xlu1 %v543_v40, %s983_s22  ;;  %705 = vrot.lane.b32.xlu0 %v697_v42, %s995_s7  ;;  %v615_v44 = vld [vmem:[#allocation2 + $0x8] sm:$0xf]  ;;  %551 = vst.msk [vmem:[#allocation3 + $0x10] sm:$0xf] %vm550_vm13, %v544_v43 }
  0xb5   : > { %v656_v45 = vld [vmem:[#allocation2 + $0x8] sm:$0xf] }
  0xb6   : > { %v574_v47 = vld [vmem:[#allocation2 + $0x8] sm:$0xf] }
  0xb7   : > { %v966_v48 = vld [vmem:[#allocation2 + $0x8] ss:$0 sps:$4 sm:$0xff]  }
  0xb8   : > { %619 = vrot.lane.b32.xlu1 %v543_v40, %s986_s25  ;;  %623 = vrot.lane.b32.xlu0 %v615_v44, %s986_s25  ;;  %v967_v49 = vld [vmem:[#allocation2 + $0x8] ss:$0 sps:$4 sm:$0xff]  }
  0xb9   : > { %v968_v50 = vld [vmem:[#allocation2 + $0x8] ss:$0 sps:$4 sm:$0xff]  }
  0xba   : > { %v969_v51 = vld [vmem:[#allocation2 + $0x8] ss:$0 sps:$4 sm:$0xff]  }
  0xbc   : > { %660 = vrot.lane.b32.xlu1 %v543_v40, %s997_s9  ;;  %664 = vrot.lane.b32.xlu0 %v656_v45, %s997_s9 }
  0xc0   : > { %560 = vrot.lane.b32.xlu1 %v543_v40, %s984_s23  ;;  %640 = vrot.lane.b32.xlu0 %v638_v46, %s996_s8 }
  0xc4   : > { %601 = vrot.lane.b32.xlu1 %v543_v40, %s998_s10  ;;  %681 = vrot.lane.b32.xlu0 %v638_v46, %s983_s22 }
  0xc8   : > { %703 = vrot.lane.b32.xlu1 %v700_v41, %s995_s7  ;;  %582 = vrot.lane.b32.xlu0 %v574_v47, %s999_s11 }
  0xcc   : > { %621 = vrot.lane.b32.xlu1 %v700_v41, %s986_s25  ;;  %644 = vrot.lane.b32.xlu0 %v966_v48, %s996_s8 }
  0xd0   : > { %662 = vrot.lane.b32.xlu1 %v700_v41, %s997_s9  ;;  %685 = vrot.lane.b32.xlu0 %v967_v49, %s983_s22 }
  0xd4   : > { %580 = vrot.lane.b32.xlu1 %v700_v41, %s999_s11  ;;  %562 = vrot.lane.b32.xlu0 %v968_v50, %s984_s23 }
  0xd8   : > { %558 = vrot.lane.b32.xlu1 %v638_v46, %s984_s23  ;;  %603 = vrot.lane.b32.xlu0 %v969_v51, %s998_s10 }
  0xdc   : > { %599 = vrot.lane.b32.xlu1 %v638_v46, %s998_s10  ;;  %578 = vrot.lane.b32.xlu0 %v543_v40, %s999_s11 }
  0xe0   : > { %744 = vperm.xlu0 %965, %v741_v53  }
 0x122   : > { %v643_v54 = vpop.permute.xlu1 %642  ;;  %v702_v55 = vpop.permute.xlu0 %701 }
 0x126   : > { %v684_v56 = vpop.permute.xlu1 %683  ;;  %v706_v57 = vpop.permute.xlu0 %705 }
 0x127   : > { %715 = vst.msk [vmem:[#allocation3 + $0x70] sm:$0xf] %vm550_vm13, %v706_v57 }
 0x12a   : > { %v620_v58 = vpop.permute.xlu1 %619  ;;  %v624_v59 = vpop.permute.xlu0 %623 }
 0x12b   : > { %633 = vst.msk [vmem:[#allocation3 + $0x40] sm:$0xf] %vm550_vm13, %v624_v59 }
 0x12e   : > { %v661_v60 = vpop.permute.xlu1 %660  ;;  %v665_v61 = vpop.permute.xlu0 %664  ;;  %v731_v62 = vld [vmem:[#allocation3 + $0x70] sm:$0xf] }
 0x12f   : > { %674 = vst.msk [vmem:[#allocation3 + $0x58] sm:$0xf] %vm550_vm13, %v665_v61  ;;  %v740_v63 = vpack.c.bf16 %v731_v62, %v731_v62 }
 0x131   : > { %v759_v1 = vsel %vm751_vm0, %v740_v63, 0 }
 0x132   : > { %v561_v2 = vpop.permute.xlu1 %560  ;;  %923 = vmatpush3.bf16.msra.mxu1 %v759_v1  ;;  %v641_v3 = vpop.permute.xlu0 %640 }
 0x133   : > { %v647_v4 = vsel %vm646_vm1, %v641_v3, %v643_v54  ;;  %924 = vmatprep.subr.bf16.mxu1 %v978_v0 }
 0x134   : > { %652 = vst [vmem:[#allocation3 + $0x30] sm:$0xf0] %v647_v4 }
 0x136   : > { %v1225_v5 = vpop.permute.xlu1 %601  ;;  %v682_v6 = vpop.permute.xlu0 %681 }
 0x137   : > { %v688_v7 = vsel %vm687_vm2, %v682_v6, %v684_v56 }
 0x138   : > { %693 = vst [vmem:[#allocation3 + $0x48] sm:$0xf0] %v688_v7 }
 0x13a   : > { %v704_v8 = vpop.permute.xlu1 %703  ;;  %v583_v9 = vpop.permute.xlu0 %582 }
 0x13b   : > { %v708_v10 = vsel %vm707_vm3, %v702_v55, %v704_v8  ;;  %v709_v11 = vsel %vm707_vm3, %v704_v8, %v706_v57  ;;  %592 = vst.msk [vmem:[#allocation3 + $0x28] sm:$0xf] %vm550_vm13, %v583_v9 }
 0x13c   : > { %713 = vst [vmem:[#allocation3 + $0x60] sm:$0xf] %v708_v10  ;;  %714 = vst [vmem:[#allocation3 + $0x68] sm:$0xf] %v709_v11 }
 0x13e   : > { %v622_v12 = vpop.permute.xlu1 %621  ;;  %v645_v13 = vpop.permute.xlu0 %644 }
 0x13f   : > { %v626_v14 = vsel %vm625_vm4, %v620_v58, %v622_v12  ;;  %v627_v15 = vsel %vm625_vm4, %v622_v12, %v624_v59  ;;  %v648_v16 = vsel %vm646_vm1, %v643_v54, %v645_v13  ;;  %654 = vst.msk [vmem:[#allocation3 + $0x40] sm:$0xf0] %vm571_vm5, %v645_v13 }
 0x140   : > { %631 = vst [vmem:[#allocation3 + $0x30] sm:$0xf] %v626_v14  ;;  %632 = vst [vmem:[#allocation3 + $0x38] sm:$0xf] %v627_v15 }
 0x141   : > { %653 = vst [vmem:[#allocation3 + $0x38] sm:$0xf0] %v648_v16 }
 0x142   : > { %v663_v17 = vpop.permute.xlu1 %662  ;;  %v686_v18 = vpop.permute.xlu0 %685 }
 0x143   : > { %v667_v19 = vsel %vm666_vm6, %v661_v60, %v663_v17  ;;  %v668_v20 = vsel %vm666_vm6, %v663_v17, %v665_v61  ;;  %v689_v21 = vsel %vm687_vm2, %v684_v56, %v686_v18  ;;  %695 = vst.msk [vmem:[#allocation3 + $0x58] sm:$0xf0] %vm571_vm5, %v686_v18  ;;  %v730_v22 = vld [vmem:[#allocation3 + $0x68] sm:$0xf]  ;;  %v729_v23 = vld [vmem:[#allocation3 + $0x60] sm:$0xf] }
 0x144   : > { %672 = vst [vmem:[#allocation3 + $0x48] sm:$0xf] %v667_v19  ;;  %673 = vst [vmem:[#allocation3 + $0x50] sm:$0xf] %v668_v20  ;;  %v739_v24 = vpack.c.bf16 %v730_v22, %v730_v22  ;;  %v738_v25 = vpack.c.bf16 %v729_v23, %v729_v23 }
 0x145   : > { %694 = vst [vmem:[#allocation3 + $0x50] sm:$0xf0] %v689_v21 }
 0x146   : > { %v581_v26 = vpop.permute.xlu1 %580  ;;  %912 = vmatprep.subr.msk.bf16.mxu0 %vm751_vm0, %v739_v24  ;;  %v563_v27 = vpop.permute.xlu0 %562  ;;  %v753_v28 = vsel %vm751_vm0, %v738_v25, 0  ;;  %v725_v33 = vld [vmem:[#allocation3 + $0x40] sm:$0xff] }
 0x147   : > { %v586_v29 = vsel %vm584_vm7, %v581_v26, %v583_v9  ;;  %v565_v30 = vsel %vm333_vm14, %v561_v2, %v563_v27  ;;  %572 = vst.msk [vmem:[#allocation3 + $0x10] sm:$0xf0] %vm571_vm5, %v563_v27  ;;  %772 = vmatpush1.bf16.msra.mxu0 %v753_v28  ;;  %v723_v40 = vld [vmem:[#allocation3 + $0x30] sm:$0xff] }
 0x148   : > { %591 = vst [vmem:[#allocation3 + $0x20] sm:$0xf] %v586_v29  ;;  %570 = vst [vmem:[#allocation3 + $0x8] sm:$0xf0] %v565_v30  ;;  %v724_v35 = vld [vmem:[#allocation3 + $0x38] sm:$0xff] }
 0x14a   : > { %v559_v31 = vpop.permute.xlu1 %558  ;;  %v604_v32 = vpop.permute.xlu0 %603  ;;  %v728_v34 = vld [vmem:[#allocation3 + $0x58] sm:$0xff] }
 0x14b   : > { %v564_v36 = vsel %vm333_vm14, %v559_v31, %v561_v2  ;;  %v607_v37 = vsel %vm605_vm8, %v1225_v5, %v604_v32  ;;  %613 = vst.msk [vmem:[#allocation3 + $0x28] sm:$0xf0] %vm571_vm5, %v604_v32  ;;  %v737_v38 = vpack.c.bf16 %v728_v34, %v725_v33  ;;  %v726_v41 = vld [vmem:[#allocation3 + $0x48] sm:$0xff]  ;;  %vm747_vm14 = vcmask 293888  }
 0x14c   : > { %v727_v39 = vld [vmem:[#allocation3 + $0x50] sm:$0xff]  ;;  %569 = vst [vmem:[#allocation3] sm:$0xf0] %v564_v36  ;;  %612 = vst [vmem:[#allocation3 + $0x20] sm:$0xf0] %v607_v37  ;;  %v735_v43 = vpack.c.bf16 %v726_v41, %v723_v40 }
 0x14d   : > { %v736_v42 = vpack.c.bf16 %v727_v39, %v724_v35  ;;  %925 = vmatpush3.bf16.msra.mxu1 %v737_v38 }
 0x14e   : > { %v600_v44 = vpop.permute.xlu1 %599  ;;  %v579_v45 = vpop.permute.xlu0 %578  ;;  %926 = vmatprep.subr.bf16.mxu1 %v978_v0  ;;  %v719_v48 = vld [vmem:[#allocation3 + $0x10] sm:$0xff] }
 0x14f   : > { %773 = vmatprep.subr.bf16.mxu0 %v736_v42  ;;  %v606_v46 = vsel %vm605_vm8, %v600_v44, %v1225_v5  ;;  %v585_v47 = vsel %vm584_vm7, %v579_v45, %v581_v26  ;;  %v718_v51 = vld [vmem:[#allocation3 + $0x8] sm:$0xff]  ;;  %v716_v0 = vld [vmem:[%s1257_s1] sm:$0xf] }
 0x150   : > { %774 = vmatpush1.bf16.msra.mxu0 %v735_v43  ;;  %611 = vst [vmem:[#allocation3 + $0x18] sm:$0xf0] %v606_v46  ;;  %590 = vst [vmem:[#allocation3 + $0x18] sm:$0xf] %v585_v47 }
 0x152   : > { %v722_v49 = vld [vmem:[#allocation3 + $0x28] sm:$0xff] }
 0x153   : > { %v734_v50 = vpack.c.bf16 %v722_v49, %v719_v48  ;;  %v721_v52 = vld [vmem:[#allocation3 + $0x20] sm:$0xff] }
 0x154   : > { %v733_v53 = vpack.c.bf16 %v721_v52, %v718_v51  ;;  %v717_v54 = vld [vmem:[#allocation3] sm:$0xff] }
 0x155   : > { %927 = vmatpush3.bf16.msra.mxu1 %v734_v50 }
 0x156   : > { %775 = vmatprep.subr.bf16.mxu0 %v733_v53 }
 0x157   : > { %v720_v55 = vld [vmem:[#allocation3 + $0x18] sm:$0xff] }
 0x158   : > { %929 = vmatmul.mubr.msk.bf16.vlgmr.msra.gmra.mxu1 %vm747_vm14, %v716_v0  ;;  %v732_v56 = vpack.c.bf16 %v720_v55, %v717_v54 }
 0x15a   : > { %776 = vmatpush1.bf16.msra.mxu0 %v732_v56 }
 0x15b   : > { %v745_v57 = vpop.permute.xlu0 %744 }
 0x15d   : > { %913 = vmatmul.mubr.msk.bf16.vlgmr.msra.gmra.mxu0 %vm747_vm14, %v716_v0 }
 0x218   : > { %v836_v58 = vpop.f32.mrf.mxu1 }
 0x219   : > { %v837_v59 = vadd.f32 %v836_v58, %v745_v57 }
 0x21a   : > { %v930_v60 = vpop.f32.mrf.mxu1 }
 0x21b   : > { %v844_v61 = vmax.f32 %v837_v59, 0.0 }
 0x21c   : > { %v839_v62 = vpop.f32.mrf.mxu1 }
 0x21d   : > { %v795_v63 = vpop.f32.mrf.mxu0  ;;  %848 = vst.msk [vmem:[%s170_s21 + $0x10] sm:$0xff] %vm847_vm9, %v844_v61 }
 0x21e   : > { %v796_v1 = vadd.f32 %v795_v63, %v745_v57  ;;  %v931_v2 = vpop.f32.mrf.mxu1 }
 0x21f   : > { %v797_v3 = vpop.f32.mrf.mxu0 }
 0x220   : > { %v842_v4 = vmax.f32 %v796_v1, 0.0  ;;  %v798_v5 = vadd.f32 %v797_v3, %v745_v57 }
 0x221   : > { %v799_v6 = vpop.f32.mrf.mxu0 }
 0x222   : > { %845 = vst [vmem:[%s170_s21] sm:$0xff] %v842_v4  ;;  %v843_v7 = vmax.f32 %v798_v5, 0.0 }
 0x223   : > { %v800_v8 = vpop.f32.mrf.mxu0 }
 0x224   : > { %846 = vst [vmem:[%s170_s21 + $0x8] sm:$0xff] %v843_v7 }
 0x225 PF: > { %s13_s12 = sadd.s32 1, %s976_s12  }
 0x226   : > { %p10_p4 = scmp.ge.s32.totalorder %s13_s12, 4  }
 0x228   :  { %12 = sbr.rel (!%p10_p4) target bundleno = 1 (0x1), region = 62 }

</bundles_post_ra>
